<compile_context>
chip_gen: v7x
topology: tpu7x:2x2x1
jax: 0.10.0
libtpu: 0.0.40
codegen_flags: <defaults>
</compile_context>

<pallas_src>
import jax
import jax.numpy as jnp
from jax.experimental import pallas as pl
from jax.experimental.pallas import tpu as pltpu


def _round_up(x, m):
    return ((x + m - 1) // m) * m


def _cdiv(a, b):
    return (a + b - 1) // b


def _mlp_kernel(x_ref, w1_ref, w2_ref, o_ref, acc_ref):
    """One (M-tile, hidden-tile) grid step; hidden axis is the fc2 reduction."""
    h_idx = pl.program_id(1)

    @pl.when(h_idx == 0)
    def _init():
        acc_ref[...] = jnp.zeros_like(acc_ref)

    # fc1 partial: (TM, D_in) @ (D_in, TH) -> (TM, TH), f32 accumulation on MXU.
    h = jnp.dot(x_ref[...], w1_ref[...], preferred_element_type=jnp.float32)

    # GELU with tanh approximation (matches nn.GELU(approximate='tanh')):
    #   0.5 * h * (1 + tanh(sqrt(2/pi) * (h + 0.044715 * h^3)))
    # written as h*(1 + 0.044715*h^2) to save one vmul; tanh goes to the EUP.
    c = 0.7978845608028654  # sqrt(2/pi)
    h_act = 0.5 * h * (1.0 + jnp.tanh(c * h * (1.0 + 0.044715 * (h * h))))

    # fc2 partial: (TM, TH) @ (TH, O_p), accumulated over hidden tiles.
    acc_ref[...] += jnp.dot(h_act.astype(w2_ref.dtype), w2_ref[...],
                            preferred_element_type=jnp.float32)

    @pl.when(h_idx == pl.num_programs(1) - 1)
    def _finalize():
        o_ref[...] = acc_ref[...].astype(o_ref.dtype)


def _device_hints():
    """(vmem_capacity_bytes, num_tensorcores) with safe fallbacks."""
    vmem_cap = 64 * 1024 * 1024   # conservative default (v7x per-TC VMEM)
    n_tc = 1
    try:
        info = pltpu.get_tpu_info()
        vmem_cap = int(getattr(info, "vmem_capacity_bytes", vmem_cap))
    except Exception:
        pass
    try:
        kind = jax.devices()[0].device_kind.lower()
        if any(tag in kind for tag in ("v4", "v5p", "v5 p", "v7", "7x")):
            n_tc = 2
    except Exception:
        pass
    return vmem_cap, n_tc


def _balance_tm(M, tm_max, min_tiles=1):
    """Balanced M tile: avoids ~2x padding when M is just above a tile edge."""
    n = max(min_tiles, _cdiv(M, tm_max))
    return min(_round_up(_cdiv(M, n), 8), _round_up(M, 8))


def _pick_th(d_hid, th_max):
    """Hidden tile that divides (or equals) the hidden dim -> no weight pad."""
    if d_hid <= th_max:
        return d_hid
    t = (th_max // 128) * 128
    while t >= 128:
        if d_hid % t == 0:
            return t
        t -= 128
    return max(128, (th_max // 128) * 128)   # ragged fallback (pads hidden)


def _vmem_footprint(tm, th, d_in, o_p, in_isz, out_isz):
    b = 2 * (tm * d_in + d_in * th + th * o_p) * in_isz   # double-buffered inputs
    b += 2 * tm * o_p * out_isz                           # double-buffered output
    b += tm * o_p * 4                                     # f32 accumulator scratch
    b += 2 * tm * th * 4                                  # fc1 pre/post-act (f32)
    return b


def mlp_pallas(x, w1_t, w2_t, *, tm=1024, th=512, compute_dtype=jnp.bfloat16):
    """MLP forward.

    x:    (B, S, in_features)
    w1_t: (in_features, hidden_features)   -- fc1.weight.T
    w2_t: (hidden_features, out_features)  -- fc2.weight.T
    Returns (B, S, out_features) in x's original dtype.
    """
    B, S, D_in = x.shape
    D_hid = w1_t.shape[1]
    D_out = w2_t.shape[1]
    M = B * S
    out_dtype = x.dtype

    # MXU wants bf16 operands: f32 matmul is a multi-pass emulation and doubles
    # the weight-stream bytes that bound v6e/v7x.  Accumulation stays f32.
    if compute_dtype is not None:
        x = x.astype(compute_dtype)
        w1_t = w1_t.astype(compute_dtype)
        w2_t = w2_t.astype(compute_dtype)

    x2d = x.reshape(M, D_in)
    in_isz = jnp.dtype(x2d.dtype).itemsize
    out_isz = jnp.dtype(out_dtype).itemsize

    O_p = _round_up(D_out, 128)   # lane-dense output -> unmasked vst

    vmem_cap, n_tc = _device_hints()
    budget = min(int(0.80 * vmem_cap), 112 * 1024 * 1024)

    # Guarantee >=2 M tiles on multi-TC chips so "parallel" can use both cores.
    min_m_tiles = 2 if (n_tc >= 2 and M >= 16) else 1

    # Tile search: shrink th first (arithmetic intensity depends only on tm),
    # then tm, until the double-buffered footprint fits the VMEM budget.
    # NOTE: for very wide D_in (>~8K) a D_in reduction axis for fc1 would keep
    # tm large on v7x; here we just let the search shrink tm instead.
    tm_req = max(128, _round_up(tm, 8))
    th_req = max(128, (th // 128) * 128)
    cands = []
    t = tm_req
    while t >= 128:
        h = th_req
        while h >= 128:
            cands.append((t, h))
            h //= 2
        t //= 2
    tm_sel, th_sel = None, None
    for tm_c, th_c in cands:
        tm_b = _balance_tm(M, tm_c, min_m_tiles)
        th_b = _pick_th(D_hid, th_c)
        tm_sel, th_sel = tm_b, th_b
        if _vmem_footprint(tm_b, th_b, D_in, O_p, in_isz, out_isz) <= budget:
            break
    tm, th = tm_sel, th_sel

    M_p = _round_up(M, tm)
    H_p = _round_up(D_hid, th)

    # Padding.  Real configs (hidden/out multiples of 128) never pad weights;
    # only x's M axis is padded.  Padded hidden columns give h = 0 ->
    # GELU(0) = 0 -> no fc2 contribution; padded output columns are sliced off.
    if M_p != M:
        x2d = jnp.pad(x2d, ((0, M_p - M), (0, 0)))
    if H_p != D_hid:
        w1_t = jnp.pad(w1_t, ((0, 0), (0, H_p - D_hid)))
    if H_p != D_hid or O_p != D_out:
        w2_t = jnp.pad(w2_t, ((0, H_p - D_hid), (0, O_p - D_out)))

    grid = (M_p // tm, H_p // th)
    n_m_tiles = grid[0]

    footprint = _vmem_footprint(tm, th, D_in, O_p, in_isz, out_isz)
    vmem_limit = int(min(max(int(1.25 * footprint), 16 * 1024 * 1024), budget))

    # Weights are re-streamed once per M tile; activations once.
    cost = pl.CostEstimate(
        flops=int(2 * M_p * (D_in * H_p + H_p * O_p)),
        transcendentals=int(M_p * H_p),
        bytes_accessed=int(n_m_tiles * (D_in * H_p + H_p * O_p) * in_isz
                           + M_p * D_in * in_isz + M_p * O_p * out_isz),
    )

    out2d_p = pl.pallas_call(
        _mlp_kernel,
        out_shape=jax.ShapeDtypeStruct((M_p, O_p), out_dtype),
        grid_spec=pltpu.PrefetchScalarGridSpec(
            num_scalar_prefetch=0,
            grid=grid,
            in_specs=[
                # x tile: full D_in per step, new M tile per i.
                pl.BlockSpec((tm, D_in), lambda i, h: (i, 0)),
                # w1 tile: (D_in, TH), streamed over the hidden axis.
                pl.BlockSpec((D_in, th), lambda i, h: (0, h)),
                # w2 tile: (TH, O_p), streamed over the hidden reduction.
                pl.BlockSpec((th, O_p), lambda i, h: (h, 0)),
            ],
            # Output block is constant across the hidden (reduction) axis.
            out_specs=pl.BlockSpec((tm, O_p), lambda i, h: (i, 0)),
            scratch_shapes=[pltpu.VMEM((tm, O_p), jnp.float32)],
        ),
        compiler_params=pltpu.CompilerParams(
            dimension_semantics=("parallel", "arbitrary"),
            vmem_limit_bytes=vmem_limit,
        ),
        cost_estimate=cost,
    )(x2d, w1_t, w2_t)

    return out2d_p[:M, :D_out].reshape(B, S, D_out)


def mlp_reference(x, w1_t, w2_t):
    h = jnp.dot(x, w1_t)
    c = 0.7978845608028654
    h = 0.5 * h * (1.0 + jnp.tanh(c * h * (1.0 + 0.044715 * (h * h))))
    return jnp.dot(h, w2_t)


if __name__ == "__main__":
    # Small shapes consistent with the module: batch=2, seq=8,
    # in_features=32, hidden_features=64, out_features=32.
    B, S = 2, 8
    in_features, hidden_features, out_features = 32, 64, 32

    key = jax.random.PRNGKey(0)
    kx, k1, k2 = jax.random.split(key, 3)

    x = jax.random.normal(kx, (B, S, in_features), dtype=jnp.float32)
    # nn.Linear stores weight as (out, in); build it that way, then transpose.
    w1 = jax.random.normal(k1, (hidden_features, in_features),
                           dtype=jnp.float32) * 0.05
    w2 = jax.random.normal(k2, (out_features, hidden_features),
                           dtype=jnp.float32) * 0.05
    w1_t = w1.T  # (in, hidden)
    w2_t = w2.T  # (hidden, out)

    out = mlp_pallas(x, w1_t, w2_t)
    out = jax.block_until_ready(out)

    # Reference on the same bf16-rounded operands (kernel runs the MXU at bf16
    # with f32 accumulation).
    bf = jnp.bfloat16
    ref = mlp_reference(x.astype(bf).astype(jnp.float32),
                        w1_t.astype(bf).astype(jnp.float32),
                        w2_t.astype(bf).astype(jnp.float32))

    assert out.shape == (B, S, out_features)
    assert out.dtype == x.dtype
    assert jnp.allclose(out, ref, atol=2e-2, rtol=2e-2)

    print("KERNEL_OK")
</pallas_src>

<mosaic_0001>
module attributes {stable_mosaic.version = 11 : i64} {
  func.func @_mlp_kernel(%arg0: i32, %arg1: i32, %arg2: memref<16x32xbf16, #tpu.memory_space<vmem>>, %arg3: memref<32x64xbf16, #tpu.memory_space<vmem>>, %arg4: memref<64x128xbf16, #tpu.memory_space<vmem>>, %arg5: memref<16x128xf32, #tpu.memory_space<vmem>>, %arg6: memref<16x128xf32, #tpu.memory_space<vmem>>) attributes {dimension_semantics = [#tpu.dimension_semantics<parallel>, #tpu.dimension_semantics<arbitrary>], iteration_bounds = array<i64: 1, 1>, scalar_prefetch = 0 : i64, scratch_operands = 1 : i64, tpu.core_type = #tpu.core_type<tc>, window_params = [{transform_indices = @transform_0, window_bounds = array<i64: 16, 32>}, {transform_indices = @transform_1, window_bounds = array<i64: 32, 64>}, {transform_indices = @transform_2, window_bounds = array<i64: 64, 128>}, {transform_indices = @transform_3, window_bounds = array<i64: 16, 128>}]} {
    %c0_i32 = arith.constant 0 : i32
    %0 = arith.cmpi eq, %arg1, %c0_i32 : i32
    %1 = arith.extui %0 : i1 to i32
    %c0_i32_0 = arith.constant 0 : i32
    %2 = arith.cmpi ne, %1, %c0_i32_0 : i32
    scf.if %2 {
      %cst_18 = arith.constant 0.000000e+00 : f32
      %29 = vector.broadcast %cst_18 : f32 to vector<16x128xf32>
      %c0_19 = arith.constant 0 : index
      %c0_20 = arith.constant 0 : index
      %30 = vector.load %arg6[%c0_19, %c0_20] : memref<16x128xf32, #tpu.memory_space<vmem>>, vector<16x128xf32>
      tpu.vector_store %arg6[%c0_19, %c0_20], %29 {strides = array<i32>} : memref<16x128xf32, #tpu.memory_space<vmem>>, vector<16x128xf32>,
    } else {
    }
    %c0 = arith.constant 0 : index
    %c0_1 = arith.constant 0 : index
    %3 = vector.load %arg2[%c0, %c0_1] : memref<16x32xbf16, #tpu.memory_space<vmem>>, vector<16x32xbf16>
    %c0_2 = arith.constant 0 : index
    %c0_3 = arith.constant 0 : index
    %4 = vector.load %arg3[%c0_2, %c0_3] : memref<32x64xbf16, #tpu.memory_space<vmem>>, vector<32x64xbf16>
    %cst = arith.constant dense<0.000000e+00> : vector<16x64xf32>
    %5 = tpu.matmul %3, %4, %cst {dimension_numbers = #tpu.dot_dimension_numbers<[1], [0], [0], [1], [0, 0, 1, 1], [], []>} : vector<16x32xbf16>, vector<32x64xbf16>, vector<16x64xf32> -> vector<16x64xf32>
    %cst_4 = arith.constant 5.000000e-01 : f32
    %6 = vector.broadcast %cst_4 : f32 to vector<16x64xf32>
    %7 = arith.mulf %6, %5 : vector<16x64xf32>
    %cst_5 = arith.constant 0.797884583 : f32
    %8 = vector.broadcast %cst_5 : f32 to vector<16x64xf32>
    %9 = arith.mulf %8, %5 : vector<16x64xf32>
    %10 = arith.mulf %5, %5 : vector<16x64xf32>
    %cst_6 = arith.constant 4.471500e-02 : f32
    %11 = vector.broadcast %cst_6 : f32 to vector<16x64xf32>
    %12 = arith.mulf %11, %10 : vector<16x64xf32>
    %cst_7 = arith.constant 1.000000e+00 : f32
    %13 = vector.broadcast %cst_7 : f32 to vector<16x64xf32>
    %14 = arith.addf %13, %12 : vector<16x64xf32>
    %15 = arith.mulf %9, %14 : vector<16x64xf32>
    %16 = math.tanh %15 : vector<16x64xf32>
    %cst_8 = arith.constant 1.000000e+00 : f32
    %17 = vector.broadcast %cst_8 : f32 to vector<16x64xf32>
    %18 = arith.addf %17, %16 : vector<16x64xf32>
    %19 = arith.mulf %7, %18 : vector<16x64xf32>
    %c0_9 = arith.constant 0 : index
    %c0_10 = arith.constant 0 : index
    %20 = vector.load %arg6[%c0_9, %c0_10] : memref<16x128xf32, #tpu.memory_space<vmem>>, vector<16x128xf32>
    %21 = arith.truncf %19 : vector<16x64xf32> to vector<16x64xbf16>
    %c0_11 = arith.constant 0 : index
    %c0_12 = arith.constant 0 : index
    %22 = vector.load %arg4[%c0_11, %c0_12] : memref<64x128xbf16, #tpu.memory_space<vmem>>, vector<64x128xbf16>
    %cst_13 = arith.constant dense<0.000000e+00> : vector<16x128xf32>
    %23 = tpu.matmul %21, %22, %cst_13 {dimension_numbers = #tpu.dot_dimension_numbers<[1], [0], [0], [1], [0, 0, 1, 1], [], []>} : vector<16x64xbf16>, vector<64x128xbf16>, vector<16x128xf32> -> vector<16x128xf32>
    %24 = arith.addf %20, %23 : vector<16x128xf32>
    %c0_14 = arith.constant 0 : index
    %c0_15 = arith.constant 0 : index
    %25 = vector.load %arg6[%c0_14, %c0_15] : memref<16x128xf32, #tpu.memory_space<vmem>>, vector<16x128xf32>
    tpu.vector_store %arg6[%c0_14, %c0_15], %24 {strides = array<i32>} : memref<16x128xf32, #tpu.memory_space<vmem>>, vector<16x128xf32>,
    %c0_i32_16 = arith.constant 0 : i32
    %26 = arith.cmpi eq, %arg1, %c0_i32_16 : i32
    %27 = arith.extui %26 : i1 to i32
    %c0_i32_17 = arith.constant 0 : i32
    %28 = arith.cmpi ne, %27, %c0_i32_17 : i32
    scf.if %28 {
      %c0_18 = arith.constant 0 : index
      %c0_19 = arith.constant 0 : index
      %29 = vector.load %arg6[%c0_18, %c0_19] : memref<16x128xf32, #tpu.memory_space<vmem>>, vector<16x128xf32>
      %c0_20 = arith.constant 0 : index
      %c0_21 = arith.constant 0 : index
      %30 = vector.load %arg5[%c0_20, %c0_21] : memref<16x128xf32, #tpu.memory_space<vmem>>, vector<16x128xf32>
      tpu.vector_store %arg5[%c0_20, %c0_21], %29 {strides = array<i32>} : memref<16x128xf32, #tpu.memory_space<vmem>>, vector<16x128xf32>,
    } else {
    }
    return
  }
  func.func @transform_0(%arg0: i32, %arg1: i32) -> (i32, i32) {
    %c0_i32 = arith.constant 0 : i32
    %c0_i32_0 = arith.constant 0 : i32
    return %arg0, %c0_i32 : i32, i32
  }
  func.func @transform_1(%arg0: i32, %arg1: i32) -> (i32, i32) {
    %c0_i32 = arith.constant 0 : i32
    %c0_i32_0 = arith.constant 0 : i32
    return %c0_i32, %arg1 : i32, i32
  }
  func.func @transform_2(%arg0: i32, %arg1: i32) -> (i32, i32) {
    %c0_i32 = arith.constant 0 : i32
    %c0_i32_0 = arith.constant 0 : i32
    return %arg1, %c0_i32 : i32, i32
  }
  func.func @transform_3(%arg0: i32, %arg1: i32) -> (i32, i32) {
    %c0_i32 = arith.constant 0 : i32
    %c0_i32_0 = arith.constant 0 : i32
    return %arg0, %c0_i32 : i32, i32
  }
}

</mosaic_0001>

<bundles_post_ra>
// kernel: tpu_custom_call.1
= control target key start
LH: loop header
LB: loop body
LE: loop exit
PB: predicated region body
PF: predicated region fallthrough
CT: control target
= control target key end

     0   :  { %8 = vsyncpa [#allocation4], 0  ;;  %s504_s0 = inlined_call_operand.hbm [shape: bf16[16,32], index: 0, kind: input, shape index: {}]   ;;  %s505_s1 = inlined_call_operand.hbm [shape: bf16[32,64], index: 1, kind: input, shape index: {}]   ;;  %s506_s2 = inlined_call_operand.hbm [shape: bf16[64,128], index: 2, kind: input, shape index: {}]   ;;  %s507_s3 = inlined_call_operand.hbm [shape: f32[16,128], index: 3, kind: output, shape index: {}]  }
   0x1   :  { %9 = vsyncpa [#allocation7], 0 }
   0x2   :  { %10 = vsyncpa [#allocation5], 0  ;;  %s410_s12 = smov [#allocation6]   ;;  %s411_s14 = smov [#allocation3]  }
   0x3   :  { %s28_s13 = sshll.u32 %s410_s12, 4  ;;  %s16_s15 = sshll.u32 %s411_s14, 4  ;;  %s29_s13 = int_to_ptr.vmem [resolvable:$true] %s28_s13  ;;  %s440_s15 = int_to_ptr.vmem [resolvable:$true] %s16_s15 }
   0x4   :  { %s316_s18 = scalar_lea.hbm %s505_s1, 256 }
   0x5   :  { %p317_p0 = scmp.ne.s32.totalorder %s505_s1, %s316_s18  ;;  %p320_p1 = scmp.lt.u32.totalorder %s316_s18, %s505_s1 }
   0x7   :  { %p322_p2 = pnand %p320_p1, %p317_p0 }
   0x9   :  { %325 = shalt.err (!%p322_p2)
}
   0xa   :  { %s326_s23 = scalar_lea.vmem %s29_s13, 256  ;;  %p331_p4 = scmp.lt.s32.totalorder %s29_s13, %s29_s13 }
   0xb   :  { %p327_p3 = scmp.ne.s32.totalorder %s29_s13, %s326_s23  ;;  %p332_p5 = scmp.lt.s32.totalorder %s326_s23, %s326_s23 }
   0xd   :  { %p333_p6 = por %p332_p5, %p331_p4 }
   0xf   :  { %p334_p7 = pnand %p333_p6, %p327_p3 }
  0x11   :  { %337 = shalt.err (!%p334_p7)
}
  0x12   :  { %s412_s24 = smov 64   ;;  %s413_s25 = smov 4  }
  0x13   :  { %34 = dma.hbm_to_vmem [thread:$0]  %s505_s1, 256, %s29_s13, [#allocation7], %s412_s24, %s412_s24, %s413_s25  }
  0x14   :  { %s338_s30 = scalar_lea.hbm %s504_s0, 128 }
  0x15   :  { %p339_p8 = scmp.ne.s32.totalorder %s504_s0, %s338_s30  ;;  %p342_p9 = scmp.lt.u32.totalorder %s338_s30, %s504_s0 }
  0x17   :  { %p344_p10 = pnand %p342_p9, %p339_p8 }
  0x19   :  { %347 = shalt.err (!%p344_p10)
}
  0x1a   :  { %s348_s8 = scalar_lea.vmem %s440_s15, 128  ;;  %p353_p12 = scmp.lt.s32.totalorder %s440_s15, %s440_s15 }
  0x1b   :  { %p349_p11 = scmp.ne.s32.totalorder %s440_s15, %s348_s8  ;;  %p354_p13 = scmp.lt.s32.totalorder %s348_s8, %s348_s8 }
  0x1d   :  { %p355_p0 = por %p354_p13, %p353_p12 }
  0x1f   :  { %p356_p1 = pnand %p355_p0, %p349_p11 }
  0x21   :  { %359 = shalt.err (!%p356_p1)
}
  0x22   :  { %22 = dma.hbm_to_vmem [thread:$0]  %s504_s0, 128, %s440_s15, [#allocation4], %s412_s24, %s412_s24, %s413_s25  }
  0x23   :  { %s414_s10 = smov [#allocation8]   ;;  %s360_s14 = scalar_lea.hbm %s506_s2, 512 }
  0x24   :  { %s40_s11 = sshll.u32 %s414_s10, 4  ;;  %p361_p2 = scmp.ne.s32.totalorder %s506_s2, %s360_s14  ;;  %s41_s11 = int_to_ptr.vmem [resolvable:$true] %s40_s11 }
  0x25   :  { %p364_p3 = scmp.lt.u32.totalorder %s360_s14, %s506_s2 }
  0x27   :  { %p366_p4 = pnand %p364_p3, %p361_p2 }
  0x29   :  { %369 = shalt.err (!%p366_p4)
}
  0x2a   :  { %s370_s20 = scalar_lea.vmem %s41_s11, 512  ;;  %p375_p6 = scmp.lt.s32.totalorder %s41_s11, %s41_s11 }
  0x2b   :  { %p371_p5 = scmp.ne.s32.totalorder %s41_s11, %s370_s20  ;;  %p376_p7 = scmp.lt.s32.totalorder %s370_s20, %s370_s20 }
  0x2d   :  { %p377_p8 = por %p376_p7, %p375_p6 }
  0x2f   :  { %p378_p9 = pnand %p377_p8, %p371_p5 }
  0x31   :  { %381 = shalt.err (!%p378_p9)
}
  0x32   :  { %46 = dma.hbm_to_vmem [thread:$0]  %s506_s2, 512, %s41_s11, [#allocation7], %s412_s24, %s412_s24, %s413_s25  }
  0x33   :  { %404 = dma.done.wait [#allocation4], 128  }
  0x34   :  { %405 = vsyncadd [#allocation4], 4294967168 }
  0x35   :  { %406 = dma.done.wait [#allocation7], 768  }
  0x36   :  { %407 = vsyncadd [#allocation7], 4294966528  ;;  %v415_v0 = vmov 0.0   ;;  %vm416_vm0 = vmmov 0   ;;  %v305_v1 = vld [vmem:[#allocation6] sm:$0xff]   ;;  %v306_v2 = vld [vmem:[#allocation6 + $0x8] sm:$0xff]  }
  0x37   :  { %275 = vmatprep.subr.bf16.mxu0 %v415_v0  ;;  %279 = vmatprep.mubr.msk.bf16.mxu0 %vm416_vm0, %v415_v0  ;;  %v307_v3 = vld [vmem:[#allocation3] sm:$0xff]   ;;  %vm86_vm1 = vcmask 261120   ;;  %v308_v4 = vld [vmem:[#allocation8] sm:$0xff]   ;;  %v310_v6 = vld [vmem:[#allocation8 + $0x10] sm:$0xff]   ;;  %vm184_vm2 = vcmask 523264   ;;  %s417_s2 = smov [#allocation9]  }
  0x38   :  { %283 = vmatprep.subr.bf16.mxu1 %v415_v0  ;;  %291 = vmatprep.mubr.msk.bf16.mxu1 %vm416_vm0, %v415_v0  ;;  %v309_v5 = vld [vmem:[#allocation8 + $0x8] sm:$0xff]   ;;  %v311_v7 = vld [vmem:[#allocation8 + $0x18] sm:$0xff]   ;;  %s245_s21 = sshll.u32 %s417_s2, 4  ;;  %s246_s21 = int_to_ptr.vmem [resolvable:$true] %s245_s21 }
  0x39   :  { %276 = vmatpush3.bf16.msra.mxu0 %v305_v1  ;;  %284 = vmatpush3.bf16.msra.mxu1 %v308_v4  ;;  %s382_s22 = scalar_lea.vmem %s246_s21, 256  ;;  %p387_p11 = scmp.lt.s32.totalorder %s246_s21, %s246_s21 }
  0x3a   :  { %277 = vmatprep.subr.bf16.mxu0 %v415_v0  ;;  %285 = vmatprep.subr.bf16.mxu1 %v415_v0  ;;  %p383_p10 = scmp.ne.s32.totalorder %s246_s21, %s382_s22  ;;  %p388_p12 = scmp.lt.s32.totalorder %s382_s22, %s382_s22 }
  0x3c   :  { %p389_p13 = por %p388_p12, %p387_p11 }
  0x3d   :  { %278 = vmatpush3.bf16.msra.mxu0 %v306_v2  ;;  %286 = vmatpush3.bf16.msra.mxu1 %v309_v5 }
  0x3e   :  { %287 = vmatprep.subr.bf16.mxu1 %v415_v0  ;;  %p390_p0 = pnand %p389_p13, %p383_p10 }
  0x40   :  { %280 = vmatmul.mubr.msk.bf16.vlgmr.msra.gmra.mrb[0].mxu0 %vm86_vm1, %v307_v3 }
  0x41   :  { %288 = vmatpush3.bf16.msra.mxu1 %v310_v6 }
  0x42   :  { %289 = vmatprep.subr.bf16.mxu1 %v415_v0 }
  0x45   :  { %290 = vmatpush3.bf16.msra.mxu1 %v311_v7 }
 0x113   :  { %v124_v8 = vpop.f32.mrb[0].mxu0 }
 0x114   :  { %v135_v9 = vmul.f32 %v124_v8, %v124_v8  ;;  %v281_v10 = vpop.f32.mrb[1].mxu0  ;;  %v133_v15 = vmul.f32 0.7978846, %v124_v8  ;;  %v131_v25 = vmul.f32 0.5, %v124_v8 }
 0x115   :  { %v127_v11 = vpop.f32.mrb[2].mxu0 }
 0x116   :  { %v137_v12 = vmul.f32 0.044715, %v135_v9  ;;  %v136_v13 = vmul.f32 %v127_v11, %v127_v11  ;;  %v282_v14 = vpop.f32.mrb[3].mxu0  ;;  %v134_v19 = vmul.f32 0.7978846, %v127_v11  ;;  %v132_v26 = vmul.f32 0.5, %v127_v11 }
 0x118   :  { %v139_v16 = vadd.f32 1.0, %v137_v12  ;;  %v138_v17 = vmul.f32 0.044715, %v136_v13 }
 0x11a   :  { %v141_v18 = vmul.f32 %v139_v16, %v133_v15  ;;  %v140_v20 = vadd.f32 1.0, %v138_v17 }
 0x11c   :  { %312 = vtanh.f32 %v141_v18  ;;  %v142_v21 = vmul.f32 %v140_v20, %v134_v19 }
 0x11e   :  { %314 = vtanh.f32 %v142_v21 }
 0x126   :  { %v313_v22 = vpop.eup %312 }
 0x127   :  { %v145_v23 = vadd.f32 1.0, %v313_v22 }
 0x128   :  { %v315_v24 = vpop.eup %314 }
 0x129   :  { %v146_v27 = vadd.f32 1.0, %v315_v24  ;;  %v147_v28 = vmul.f32 %v145_v23, %v131_v25 }
 0x12b   :  { %v148_v29 = vmul.f32 %v146_v27, %v132_v26 }
 0x12d   :  { %v151_v30 = vpack.c.bf16 %v148_v29, %v147_v28 }
 0x12f   :  { %292 = vmatmul.mubr.msk.bf16.vlgmr.msra.gmra.mrb[0].mxu1 %vm184_vm2, %v151_v30 }
 0x202   :  { %v222_v31 = vpop.f32.mrb[0].mxu1 }
 0x203   :  { %238 = vst [vmem:[#allocation9] sm:$0xff] %v222_v31  ;;  %v293_v32 = vpop.f32.mrb[1].mxu1 }
 0x204   :  { %v225_v33 = vpop.f32.mrb[2].mxu1 }
 0x205   :  { %239 = vst [vmem:[#allocation9 + $0x8] sm:$0xff] %v225_v33  ;;  %v294_v34 = vpop.f32.mrb[3].mxu1 }
 0x206   :  { %393 = shalt.err (!%p390_p0)
}
 0x207   :  { %s394_s25 = scalar_lea.hbm %s507_s3, 256 }
 0x208   :  { %p395_p1 = scmp.ne.s32.totalorder %s507_s3, %s394_s25  ;;  %p398_p2 = scmp.lt.u32.totalorder %s394_s25, %s507_s3 }
 0x20a   :  { %p400_p3 = pnand %p398_p2, %p395_p1 }
 0x20c   :  { %403 = shalt.err (!%p400_p3)
}
 0x20d   :  { %s418_s30 = smov 128   ;;  %s419_s4 = smov 8  }
 0x20e   :  { %251 = dma.vmem_to_hbm [thread:$0]  %s246_s21, 256, %s507_s3, [#allocation5], %s418_s30, %s418_s30, %s419_s4  }
 0x20f   :  { %408 = dma.done.wait [#allocation5], 256  }
 0x210   :  { %409 = vsyncadd [#allocation5], 4294967040 }
 0x211   :  { %255 = vsyncpa [#allocation4], 1 }
 0x212   :  { %256 = vsyncpa [#allocation7], 1 }
 0x213   :  { %257 = vsyncpa [#allocation5], 1 }

</bundles_post_ra>
